<compile_context>
chip_gen: v5e
topology: v5e:2x2
jax: 0.10.0
libtpu: 0.0.40
codegen_flags: <defaults>
</compile_context>

<pallas_src>
import functools

import jax
import jax.numpy as jnp
from jax.experimental import pallas as pl
from jax.experimental.pallas import tpu as pltpu

BN_EPS = 1e-5
LANE = 128
MAX_TB = 2048          # rows per grid step cap; working set stays << VMEM


def _actor_kernel(x_ref, w1_ref, w2_ref, bias_ref, o_ref):
    """fc1 + ReLU6 + (BN-folded, lane-padded) fc2 + softmax for one batch tile."""
    H = w1_ref.shape[1]
    A_pad = w2_ref.shape[1]

    x = x_ref[...]                                   # [TB, D_in]
    b1 = bias_ref[0:1, 0:H]                          # [1, H]
    b2 = bias_ref[1:2, 0:A_pad]                      # [1, A_pad]

    # fc1 (+ bias); dropout is identity in eval mode.
    h = jnp.dot(x, w1_ref[...], preferred_element_type=jnp.float32) + b1

    # ReLU6
    h = jnp.minimum(jnp.maximum(h, 0.0), 6.0)

    # fc2 with BN1 (rows) / BN2 (cols) pre-folded; padded columns carry zero
    # weights and a -1e9 bias so their softmax probability is ~0.
    z = jnp.dot(h, w2_ref[...], preferred_element_type=jnp.float32) + b2

    # Numerically stable softmax over the action axis; exact reciprocal so
    # every row sums to 1 (these probabilities feed categorical sampling).
    z = z - jnp.max(z, axis=1, keepdims=True)
    e = jnp.exp(z)
    o_ref[...] = e / jnp.sum(e, axis=1, keepdims=True)


def fold_params(params):
    """Fold eval-mode BN1/BN2 into fc2, lane-pad the action dim, and pack the
    per-feature bias rows into one slab.

    Run this ONCE per parameter update (outside the jitted forward) and reuse
    the folded arrays across rollout steps -- it is ~20 tiny XLA ops that would
    otherwise dominate the per-call latency for small RL batches.
    """
    (w1, b1, g1, beta1, m1, v1, w2, b2, g2, beta2, m2, v2) = params
    H = w1.shape[1]
    A = w2.shape[1]

    # BN1(h) = h * s1 + t1   (applied before fc2, which is linear -> fold rows)
    s1 = g1 * jax.lax.rsqrt(v1 + BN_EPS)          # [1, H]
    t1 = beta1 - m1 * s1                          # [1, H]
    w2f = w2 * s1.T                               # scale rows of W2
    b2f = t1 @ w2 + b2                            # [1, A]

    # BN2(z) = z * s2 + t2   (applied after fc2 -> fold columns)
    s2 = g2 * jax.lax.rsqrt(v2 + BN_EPS)          # [1, A]
    t2 = beta2 - m2 * s2                          # [1, A]
    w2f = w2f * s2
    b2f = b2f * s2 + t2

    # Lane-pad the action axis so output stores are unmasked full-lane vst.
    A_pad = ((A + LANE - 1) // LANE) * LANE
    w2p = jnp.zeros((H, A_pad), jnp.float32).at[:, :A].set(w2f)
    b2p = jnp.full((1, A_pad), -1e9, jnp.float32).at[:, :A].set(b2f)

    # Pack b1 and the folded/padded b2 into one [2, max(H, A_pad)] slab.
    W = max(H, A_pad)
    bias = jnp.zeros((2, W), jnp.float32)
    bias = bias.at[0, :H].set(b1[0])
    bias = bias.at[1, :A_pad].set(b2p[0])
    return w1, w2p, bias


def _pick_tb(batch):
    """Rows per grid step: the whole batch in one step when it fits, else
    >= 2 steps of <= MAX_TB rows (multiple of 8) so the 'parallel' batch axis
    can shard across both v7x TensorCores."""
    if batch <= MAX_TB:
        return batch
    half = -(-batch // 2)                      # ceil(B / 2)
    return min(MAX_TB, ((half + 7) // 8) * 8)


@functools.partial(jax.jit, static_argnames=("action",))
def actor_forward(x, w1, w2p, bias, *, action):
    """x: [B, D_in] f32; (w1, w2p, bias) from fold_params().
    Returns softmax probabilities [B, action]."""
    B, D_in = x.shape
    H = w1.shape[1]
    A_pad = w2p.shape[1]
    TB = _pick_tb(B)

    out = pl.pallas_call(
        _actor_kernel,
        out_shape=jax.ShapeDtypeStruct((B, A_pad), jnp.float32),
        grid_spec=pltpu.PrefetchScalarGridSpec(
            num_scalar_prefetch=0,
            grid=(pl.cdiv(B, TB),),
            in_specs=[
                pl.BlockSpec((TB, D_in), lambda i: (i, 0)),      # x tile
                pl.BlockSpec((D_in, H), lambda i: (0, 0)),       # W1 (resident)
                pl.BlockSpec((H, A_pad), lambda i: (0, 0)),      # folded W2
                pl.BlockSpec(bias.shape, lambda i: (0, 0)),      # packed biases
            ],
            out_specs=pl.BlockSpec((TB, A_pad), lambda i: (i, 0)),
        ),
        compiler_params=pltpu.CompilerParams(
            dimension_semantics=("parallel",)),                  # v7x: 2-TC shard
    )(x, w1, w2p, bias)
    return out[:, :action]


def init_params(key, input_dim, hidden_size, action_size):
    """Deterministic parameter init (shapes match the nn.Module)."""
    ks = jax.random.split(key, 6)
    # Linear weights stored transposed: [in, out]
    w1 = jax.random.normal(ks[0], (input_dim, hidden_size), jnp.float32) * 0.1
    b1 = jax.random.normal(ks[1], (1, hidden_size), jnp.float32) * 0.1
    w2 = jax.random.normal(ks[2], (hidden_size, action_size), jnp.float32) * 0.1
    b2 = jax.random.normal(ks[3], (1, action_size), jnp.float32) * 0.1
    # BatchNorm1d(hidden): gamma, beta, running_mean, running_var
    g1 = jnp.ones((1, hidden_size), jnp.float32) * 1.1
    beta1 = jnp.full((1, hidden_size), 0.05, jnp.float32)
    m1 = jax.random.normal(ks[4], (1, hidden_size), jnp.float32) * 0.05
    v1 = jnp.ones((1, hidden_size), jnp.float32) * 0.9
    # BatchNorm1d(action)
    g2 = jnp.ones((1, action_size), jnp.float32) * 0.95
    beta2 = jnp.full((1, action_size), -0.02, jnp.float32)
    m2 = jax.random.normal(ks[5], (1, action_size), jnp.float32) * 0.05
    v2 = jnp.ones((1, action_size), jnp.float32) * 1.1
    return (w1, b1, g1, beta1, m1, v1, w2, b2, g2, beta2, m2, v2)


def reference_forward(x, params):
    """Pure-JAX reference of the same eval-mode forward (unfolded)."""
    (w1, b1, g1, beta1, m1, v1, w2, b2, g2, beta2, m2, v2) = params
    h = x @ w1 + b1
    h = jnp.clip(h, 0.0, 6.0)
    h = (h - m1) / jnp.sqrt(v1 + BN_EPS) * g1 + beta1
    z = h @ w2 + b2
    z = (z - m2) / jnp.sqrt(v2 + BN_EPS) * g2 + beta2
    return jax.nn.softmax(z, axis=1)


if __name__ == "__main__":
    # Small shapes implied by the module: input_shape=(16,), hidden=32, action=8
    batch, input_dim, hidden_size, action_size = 8, 16, 32, 8

    key = jax.random.PRNGKey(0)
    kx, kp = jax.random.split(key)
    x = jax.random.normal(kx, (batch, input_dim), jnp.float32)
    params = init_params(kp, input_dim, hidden_size, action_size)

    # Fold/pack once (per parameter update); hot path reuses the folded arrays.
    w1, w2p, bias = jax.block_until_ready(fold_params(params))

    out = actor_forward(x, w1, w2p, bias, action=action_size)
    out = jax.block_until_ready(out)

    ref = reference_forward(x, params)
    assert out.shape == (batch, action_size)
    assert jnp.allclose(jnp.sum(out, axis=1), 1.0, atol=1e-4)
    assert jnp.allclose(out, ref, atol=1e-4, rtol=1e-4)

    print("KERNEL_OK")
</pallas_src>

<mosaic_0001>
module attributes {stable_mosaic.version = 11 : i64} {
  func.func @_actor_kernel(%arg0: i32, %arg1: memref<8x16xf32, #tpu.memory_space<vmem>>, %arg2: memref<16x32xf32, #tpu.memory_space<vmem>>, %arg3: memref<32x128xf32, #tpu.memory_space<vmem>>, %arg4: memref<2x128xf32, #tpu.memory_space<vmem>>, %arg5: memref<8x128xf32, #tpu.memory_space<vmem>>) attributes {dimension_semantics = [#tpu.dimension_semantics<parallel>], iteration_bounds = array<i64: 1>, scalar_prefetch = 0 : i64, scratch_operands = 0 : i64, tpu.core_type = #tpu.core_type<tc>, window_params = [{transform_indices = @transform_0, window_bounds = array<i64: 8, 16>}, {pipeline_mode = #tpu.pipeline_mode<synchronous>, transform_indices = @transform_1, window_bounds = array<i64: 16, 32>}, {pipeline_mode = #tpu.pipeline_mode<synchronous>, transform_indices = @transform_2, window_bounds = array<i64: 32, 128>}, {pipeline_mode = #tpu.pipeline_mode<synchronous>, transform_indices = @transform_3, window_bounds = array<i64: 2, 128>}, {transform_indices = @transform_4, window_bounds = array<i64: 8, 128>}]} {
    %c0 = arith.constant 0 : index
    %c0_0 = arith.constant 0 : index
    %0 = vector.load %arg1[%c0, %c0_0] : memref<8x16xf32, #tpu.memory_space<vmem>>, vector<8x16xf32>
    %c0_1 = arith.constant 0 : index
    %c0_2 = arith.constant 0 : index
    %1 = vector.load %arg4[%c0_1, %c0_2] : memref<2x128xf32, #tpu.memory_space<vmem>>, vector<1x32xf32>
    %c1 = arith.constant 1 : index
    %c0_3 = arith.constant 0 : index
    %2 = vector.load %arg4[%c1, %c0_3] : memref<2x128xf32, #tpu.memory_space<vmem>>, vector<1x128xf32>
    %c0_4 = arith.constant 0 : index
    %c0_5 = arith.constant 0 : index
    %3 = vector.load %arg2[%c0_4, %c0_5] : memref<16x32xf32, #tpu.memory_space<vmem>>, vector<16x32xf32>
    %cst = arith.constant dense<0.000000e+00> : vector<8x32xf32>
    %4 = tpu.matmul %0, %3, %cst {dimension_numbers = #tpu.dot_dimension_numbers<[1], [0], [0], [1], [0, 0, 1, 1], [], []>} : vector<8x16xf32>, vector<16x32xf32>, vector<8x32xf32> -> vector<8x32xf32>
    %5 = vector.broadcast %1 : vector<1x32xf32> to vector<8x32xf32>
    %6 = arith.addf %4, %5 : vector<8x32xf32>
    %cst_6 = arith.constant 0.000000e+00 : f32
    %7 = vector.broadcast %cst_6 : f32 to vector<8x32xf32>
    %8 = arith.maximumf %6, %7 : vector<8x32xf32>
    %cst_7 = arith.constant 6.000000e+00 : f32
    %9 = vector.broadcast %cst_7 : f32 to vector<8x32xf32>
    %10 = arith.minimumf %8, %9 : vector<8x32xf32>
    %c0_8 = arith.constant 0 : index
    %c0_9 = arith.constant 0 : index
    %11 = vector.load %arg3[%c0_8, %c0_9] : memref<32x128xf32, #tpu.memory_space<vmem>>, vector<32x128xf32>
    %cst_10 = arith.constant dense<0.000000e+00> : vector<8x128xf32>
    %12 = tpu.matmul %10, %11, %cst_10 {dimension_numbers = #tpu.dot_dimension_numbers<[1], [0], [0], [1], [0, 0, 1, 1], [], []>} : vector<8x32xf32>, vector<32x128xf32>, vector<8x128xf32> -> vector<8x128xf32>
    %13 = vector.broadcast %2 : vector<1x128xf32> to vector<8x128xf32>
    %14 = arith.addf %12, %13 : vector<8x128xf32>
    %cst_11 = arith.constant dense<0xFF800000> : vector<8xf32>
    %15 = vector.multi_reduction <maximumf>, %14, %cst_11 [1] : vector<8x128xf32> to vector<8xf32>
    %16 = vector.shape_cast %15 : vector<8xf32> to vector<8x1xf32>
    %17 = vector.broadcast %16 : vector<8x1xf32> to vector<8x128xf32>
    %18 = arith.subf %14, %17 : vector<8x128xf32>
    %19 = math.exp %18 : vector<8x128xf32>
    %cst_12 = arith.constant dense<0.000000e+00> : vector<8xf32>
    %20 = vector.multi_reduction <add>, %19, %cst_12 [1] : vector<8x128xf32> to vector<8xf32>
    %21 = vector.shape_cast %20 : vector<8xf32> to vector<8x1xf32>
    %22 = vector.broadcast %21 : vector<8x1xf32> to vector<8x128xf32>
    %23 = arith.divf %19, %22 : vector<8x128xf32>
    %c0_13 = arith.constant 0 : index
    %c0_14 = arith.constant 0 : index
    %24 = vector.load %arg5[%c0_13, %c0_14] : memref<8x128xf32, #tpu.memory_space<vmem>>, vector<8x128xf32>
    tpu.vector_store %arg5[%c0_13, %c0_14], %23 {strides = array<i32>} : memref<8x128xf32, #tpu.memory_space<vmem>>, vector<8x128xf32>,
    return
  }
  func.func @transform_0(%arg0: i32) -> (i32, i32) {
    %c0_i32 = arith.constant 0 : i32
    %c0_i32_0 = arith.constant 0 : i32
    return %arg0, %c0_i32 : i32, i32
  }
  func.func @transform_1(%arg0: i32) -> (i32, i32) {
    %c0_i32 = arith.constant 0 : i32
    %c0_i32_0 = arith.constant 0 : i32
    %c0_i32_1 = arith.constant 0 : i32
    return %c0_i32, %c0_i32_0 : i32, i32
  }
  func.func @transform_2(%arg0: i32) -> (i32, i32) {
    %c0_i32 = arith.constant 0 : i32
    %c0_i32_0 = arith.constant 0 : i32
    %c0_i32_1 = arith.constant 0 : i32
    return %c0_i32, %c0_i32_0 : i32, i32
  }
  func.func @transform_3(%arg0: i32) -> (i32, i32) {
    %c0_i32 = arith.constant 0 : i32
    %c0_i32_0 = arith.constant 0 : i32
    %c0_i32_1 = arith.constant 0 : i32
    return %c0_i32, %c0_i32_0 : i32, i32
  }
  func.func @transform_4(%arg0: i32) -> (i32, i32) {
    %c0_i32 = arith.constant 0 : i32
    %c0_i32_0 = arith.constant 0 : i32
    return %arg0, %c0_i32 : i32, i32
  }
}

</mosaic_0001>

<bundles_post_ra>
// kernel: actor_forward.1
= control target key start
LH: loop header
LB: loop body
LE: loop exit
PB: predicated region body
PF: predicated region fallthrough
CT: control target
= control target key end

     0   :  { %9 = vsyncpa [#allocation3], 0  ;;  %s330_s0 = inlined_call_operand.hbm [shape: f32[8,16], index: 0, kind: input, shape index: {}]   ;;  %s331_s1 = inlined_call_operand.hbm [shape: f32[16,32], index: 1, kind: input, shape index: {}]   ;;  %s332_s2 = inlined_call_operand.hbm [shape: f32[32,128], index: 2, kind: input, shape index: {}]   ;;  %s333_s3 = inlined_call_operand.vmem [shape: f32[2,128], index: 3, kind: input, shape index: {}]   ;;  %s334_s4 = inlined_call_operand.hbm [shape: f32[8,128], index: 4, kind: output, shape index: {}]  }
   0x1   :  { %10 = vsyncpa [#allocation6], 0  ;;  %s27_s17 = sshll.u32 %s331_s1, 4  ;;  %s28_s17 = int_to_ptr.hbm [resolvable:$true] %s27_s17 }
   0x2   :  { %11 = vsyncpa [#allocation4], 0  ;;  %s281_s18 = smov [#allocation5]   ;;  %s17_s22 = sshll.u32 %s330_s0, 4  ;;  %s18_s22 = int_to_ptr.hbm [resolvable:$true] %s17_s22 }
   0x3   :  { %s29_s19 = sshll.u32 %s281_s18, 4  ;;  %s282_s23 = smov 128   ;;  %s30_s19 = int_to_ptr.vmem [resolvable:$true] %s29_s19 }
   0x4   :  { %s283_s24 = smov 8   ;;  %s284_s25 = smov [#allocation2]  }
   0x5   :  { %35 = dma.hbm_to_vmem [thread:$0]  %s28_s17, 256, %s30_s19, [#allocation6], %s282_s23, %s282_s23, %s283_s24  }
   0x6   :  { %s19_s26 = sshll.u32 %s284_s25, 4  ;;  %s40_s29 = sshll.u32 %s332_s2, 4  ;;  %s20_s26 = int_to_ptr.vmem [resolvable:$true] %s19_s26  ;;  %s41_s29 = int_to_ptr.hbm [resolvable:$true] %s40_s29 }
   0x7   :  { %22 = dma.hbm_to_vmem [thread:$0]  %s18_s22, 128, %s20_s26, [#allocation3]  }
   0x8   :  { %s285_s1 = smov [#allocation7]  }
   0x9   :  { %s42_s30 = sshll.u32 %s285_s1, 4  ;;  %s43_s30 = int_to_ptr.vmem [resolvable:$true] %s42_s30 }
   0xa   :  { %48 = dma.hbm_to_vmem [thread:$0]  %s41_s29, 512, %s43_s30, [#allocation6], %s282_s23, %s282_s23, %s283_s24  }
   0xb   :  { %275 = dma.done.wait [#allocation3], 128  }
   0xc   :  { %276 = vsyncadd [#allocation3], 4294967168 }
   0xd   :  { %277 = dma.done.wait [#allocation6], 768  }
   0xe   :  { %278 = vsyncadd [#allocation6], 4294966528  ;;  %v67_v0 = vld [vmem:[#allocation5 + $0x8] sm:$0xff]  ;;  %v66_v1 = vld [vmem:[#allocation5] sm:$0xff]  ;;  %vm69_vm0 = vcmask 130048   ;;  %vm100_vm1 = vcmask 261120  }
   0xf   :  { %87 = vmatpush.msra.mxu0 %v67_v0  ;;  %v63_v2 = vld [vmem:[#allocation2] sm:$0xff]  ;;  %v98_v3 = vld [vmem:[#allocation7 + $0x18] sm:$0xff]  ;;  %v97_v4 = vld [vmem:[#allocation7 + $0x10] sm:$0xff]  ;;  %s154_s10 = sshll.u32 %s334_s4, 4  ;;  %s155_s10 = int_to_ptr.hbm [resolvable:$true] %s154_s10 }
  0x10   :  { %116 = vmatpush.msra.mxu1 %v98_v3  ;;  %v96_v5 = vld [vmem:[#allocation7 + $0x8] sm:$0xff]  ;;  %v95_v6 = vld [vmem:[#allocation7] sm:$0xff] }
  0x11   :  { %88 = vmatpush.msra.mxu0 %v66_v1  ;;  %v173_v7 = vld [vmem:[%s333_s3] ss:$0 sm:$0xff]  ;;  %v174_v12 = vld [vmem:[%s333_s3 + $0x1] ss:$0 sm:$0xff]  ;;  %s286_s3 = smov [#allocation8]  }
  0x12   :  { %165 = vmatmul.msk.f32.vlgmr.msra.gmra.mxu0 %vm69_vm0, %v63_v2  ;;  %117 = vmatpush.msra.mxu1 %v97_v4  ;;  %s152_s7 = sshll.u32 %s286_s3, 4  ;;  %s153_s7 = int_to_ptr.vmem [resolvable:$true] %s152_s7 }
  0x14   :  { %118 = vmatpush.msra.mxu1 %v96_v5 }
  0x16   :  { %119 = vmatpush.msra.mxu1 %v95_v6 }
  0x8f   :  { %v90_v8 = vpop.f32.mrf.mxu0 }
  0x90   :  { %v91_v9 = vadd.f32 %v173_v7, %v90_v8 }
  0x92   :  { %v93_v10 = vmax.f32 %v91_v9, 0.0 }
  0x94   :  { %v94_v11 = vmin.f32 %v93_v10, 6.0 }
  0x96   :  { %166 = vmatmul.msk.f32.vlgmr.msra.gmra.mxu1 %vm100_vm1, %v94_v11 }
 0x113   :  { %v121_v13 = vpop.f32.mrf.mxu1 }
 0x114   :  { %v122_v14 = vadd.f32 %v174_v12, %v121_v13 }
 0x116   :  { %124 = vmax.xlane.f32.xlu0 %v122_v14 }
 0x189   :  { %v125_v15 = vpop.xlane.xlu0 %124 }
 0x18a   :  { %v126_v16 = vsub.f32 %v122_v14, %v125_v15 }
 0x18c   :  { %v127_v17 = vmul.f32 1.442695, %v126_v16 }
 0x18e   :  { %175 = vpow2.f32 %v127_v17 }
 0x194   :  { %v176_v18 = vpop.eup %175 }
 0x195   :  { %129 = vadd.xlane.f32.xlu0 %v176_v18 }
 0x208   :  { %v130_v19 = vpop.xlane.xlu0 %129 }
 0x209   :  { %177 = vrcp.f32 %v130_v19  ;;  %v142_v23 = vand.u32 2147483648, %v130_v19  ;;  %v140_v25 = vand.u32 2147483647, %v130_v19  ;;  %vm136_vm3 = vweird.f32 %v130_v19 }
 0x20b   :  { %v143_v27 = vor.u32 1.1754944e-38, %v142_v23  ;;  %vm141_vm5 = vcmp.eq.f32.partialorder %v140_v25, 8.507059e+37 }
 0x20f   :  { %v178_v20 = vpop.eup %177 }
 0x210   :  { %v132_v21 = vmul.f32 %v178_v20, %v130_v19  ;;  %vm137_vm2 = vweird.f32 %v178_v20 }
 0x211   :  { %vm138_vm4 = vmor %vm136_vm3, %vm137_vm2 }
 0x212   :  { %v133_v22 = vsub.f32 1.0, %v132_v21 }
 0x214   :  { %v134_v24 = vmul.f32 %v178_v20, %v133_v22 }
 0x216   :  { %v135_v26 = vadd.f32 %v178_v20, %v134_v24 }
 0x218   :  { %v139_v28 = vsel %vm138_vm4, %v178_v20, %v135_v26 }
 0x219   :  { %v144_v29 = vsel %vm141_vm5, %v143_v27, %v139_v28 }
 0x21a   :  { %v145_v30 = vmul.f32 %v176_v18, %v144_v29 }
 0x21c   :  { %146 = vst [vmem:[#allocation8] sm:$0xff] %v145_v30 }
 0x21d   :  { %157 = dma.vmem_to_hbm [thread:$0]  %s153_s7, 128, %s155_s10, [#allocation4]  }
 0x21e   :  { %279 = dma.done.wait [#allocation4], 128  }
 0x21f   :  { %280 = vsyncadd [#allocation4], 4294967168 }
 0x220   :  { %162 = vsyncpa [#allocation3], 1 }
 0x221   :  { %163 = vsyncpa [#allocation6], 1 }
 0x222   :  { %164 = vsyncpa [#allocation4], 1 }

</bundles_post_ra>
